<compile_context>
chip_gen: v7x
topology: tpu7x:2x2x1
jax: 0.10.0
libtpu: 0.0.40
codegen_flags: <defaults>
</compile_context>

<pallas_src>
import functools

import jax
import jax.numpy as jnp
from jax import lax
from jax.experimental import pallas as pl
from jax.experimental.pallas import tpu as pltpu


def _cdiv(a, b):
    return -(-a // b)


def _round_up(a, m):
    return _cdiv(a, m) * m


def _device_budget():
    """(max_tile_bytes, vmem_limit_bytes) tuned per TPU generation."""
    try:
        kind = jax.devices()[0].device_kind.lower()
    except Exception:
        kind = ""
    if "v7" in kind or "7x" in kind:
        # v7x: 64 MiB physical VMEM -> keep the double-buffered output <= 8 MiB.
        return 4 * 1024 * 1024, 32 * 1024 * 1024
    # v5e / v6e: 128 MiB physical VMEM -> bigger tiles, fewer grid steps.
    return 8 * 1024 * 1024, 64 * 1024 * 1024


def _choose_tiles(T, depth, out_dtype, max_tile_bytes):
    """Pick (tile_t, tile_d) so the *padded* output block fits the budget."""
    itemsize = jnp.dtype(out_dtype).itemsize
    row_pack = max(8, 32 // itemsize)       # sublane packing: 8 f32 / 16 bf16 / 32 i8
    lanes_full = _round_up(depth, 128)      # lane padding of the VMEM block

    # Depth tiling only when even a 512-row slab of the full (lane-padded)
    # depth would bust the budget (e.g. 32k-64k vocab one-hots).
    if lanes_full * itemsize * 512 <= max_tile_bytes:
        tile_d = depth
    else:
        tile_d = max(128, (max_tile_bytes // (itemsize * 512)) // 128 * 128)
        tile_d = min(tile_d, depth)

    bytes_per_row = _round_up(tile_d, 128) * itemsize
    max_rows = max(row_pack, max_tile_bytes // bytes_per_row)
    if T <= max_rows:
        return T, tile_d                    # full T dim -> always a legal block
    return max(row_pack, (max_rows // row_pack) * row_pack), tile_d


def _choose_chunk_t(tile_t, tile_d, max_chunk_bytes=1 << 20):
    """Rows per in-kernel compute step: keeps iota/compare/cast temps ~<=1 MiB."""
    lane_pad = _round_up(tile_d, 128)
    target = max(8, (max_chunk_bytes // (lane_pad * 4)) // 8 * 8)
    if tile_t <= target:
        return tile_t
    for c in (2048, 1024, 512, 256, 128, 64, 32, 16, 8):
        if c <= target and tile_t % c == 0:
            return c
    return tile_t


def _make_onehot_kernel(depth, tile_d, chunk_t, n_chunks, n_d, use_mask,
                        out_dtype):
    mask = depth - 1

    def do_chunk(x_ref, o_ref, d_start, c):
        r = c * chunk_t
        if not isinstance(c, int):
            r = pl.multiple_of(r, chunk_t)
        x = x_ref[0, pl.ds(r, chunk_t), :]                 # (chunk_t, 1) int32
        idx = (x & mask) if use_mask else (x % depth)      # floor-mod (== torch %)
        iota = lax.broadcasted_iota(jnp.int32, (chunk_t, tile_d), 1)
        if n_d > 1:
            iota = iota + d_start
        o_ref[0, pl.ds(r, chunk_t), :] = (iota == idx).astype(out_dtype)

    def kernel(x_ref, o_ref):
        # x_ref: (1, tile_t, 1) int32 ; o_ref: (1, tile_t, tile_d) out_dtype
        # Partial T / depth tiles: Pallas masks the out-of-range output region
        # on writeback, so computing a one-hot for the padded garbage rows /
        # lanes is harmless.  (Do not lose this masking if this is ever
        # refactored to manual DMA via memory_space=pl.ANY.)
        d_start = pl.program_id(2) * tile_d if n_d > 1 else 0
        if n_chunks == 1:
            do_chunk(x_ref, o_ref, d_start, 0)
        else:
            def body(c, carry):
                do_chunk(x_ref, o_ref, d_start, c)
                return carry
            lax.fori_loop(0, n_chunks, body, 0)

    return kernel


def one_hot(x, depth, *, out_dtype=jnp.float32, tile_t=None, tile_d=None,
            chunk_t=None, max_tile_bytes=None, vmem_limit_bytes=None):
    """x: (B, T) integer -> (B, T, depth) one-hot of (x % depth)."""
    B, T = x.shape
    # NOTE: a cast from int64 would truncate indices >= 2^31 before the mod;
    # irrelevant for realistic one-hot inputs (mu-law class ids), and JAX
    # defaults to int32 indices anyway.
    x3 = x.astype(jnp.int32).reshape(B, T, 1)

    dflt_tile_bytes, dflt_vmem = _device_budget()
    if max_tile_bytes is None:
        max_tile_bytes = dflt_tile_bytes
    if vmem_limit_bytes is None:
        vmem_limit_bytes = dflt_vmem

    auto_t, auto_d = _choose_tiles(T, depth, out_dtype, max_tile_bytes)
    tile_t = auto_t if tile_t is None else tile_t
    tile_d = auto_d if tile_d is None else tile_d

    # Sanitize (possibly user-supplied) tiles against block-shape legality:
    # second-to-last block dim multiple of 8 (or full), last multiple of 128
    # (or full).
    tile_t = min(tile_t, T)
    if tile_t < T:
        tile_t = min(_round_up(tile_t, 8), T)
    tile_d = min(tile_d, depth)
    if tile_d < depth:
        tile_d = min(_round_up(tile_d, 128), depth)

    n_t = _cdiv(T, tile_t)
    n_d = _cdiv(depth, tile_d)

    # Megacore (v7x has 2 TCs): make sure the parallel grid has >= 2 steps.
    if B * n_t * n_d < 2:
        half = min(_round_up(_cdiv(T, 2), 8), T)
        if half < T:
            tile_t = half
            n_t = _cdiv(T, tile_t)

    # In-kernel compute chunking over the T axis of the tile.
    if chunk_t is None:
        chunk_t = _choose_chunk_t(tile_t, tile_d)
    chunk_t = min(chunk_t, tile_t)
    if tile_t % chunk_t != 0:
        chunk_t = tile_t
    n_chunks = tile_t // chunk_t

    use_mask = depth > 0 and (depth & (depth - 1)) == 0  # power-of-two depth

    grid = (B, n_t, n_d)
    itemsize = jnp.dtype(out_dtype).itemsize
    cost = pl.CostEstimate(
        flops=0,
        transcendentals=0,
        bytes_accessed=B * T * depth * itemsize + B * T * 4 * n_d,
    )

    return pl.pallas_call(
        _make_onehot_kernel(depth, tile_d, chunk_t, n_chunks, n_d, use_mask,
                            out_dtype),
        out_shape=jax.ShapeDtypeStruct((B, T, depth), out_dtype),
        grid=grid,
        in_specs=[pl.BlockSpec((1, tile_t, 1), lambda b, t, d: (b, t, 0))],
        out_specs=pl.BlockSpec((1, tile_t, tile_d), lambda b, t, d: (b, t, d)),
        compiler_params=pltpu.CompilerParams(
            dimension_semantics=("parallel", "parallel", "parallel"),
            vmem_limit_bytes=vmem_limit_bytes,
        ),
        cost_estimate=cost,
    )(x3)


# Recommended fast path: 2x less HBM writeback, bit-identical 0/1 values.
one_hot_fast = functools.partial(one_hot, out_dtype=jnp.bfloat16)


def one_hot_ref(x, depth, out_dtype=jnp.float32):
    # Pure-JAX reference (floor-mod, same as torch `%` / torch.remainder).
    return jax.nn.one_hot(x % depth, depth, dtype=out_dtype)


if __name__ == "__main__":
    key = jax.random.PRNGKey(0)

    # 1) Mu-law WaveNet case: power-of-two depth, negative indices exercise
    #    the AND-as-floor-mod path.
    B, T, depth = 2, 16, 256
    x = jax.random.randint(key, (B, T), minval=-depth, maxval=3 * depth,
                           dtype=jnp.int32)
    out = jax.block_until_ready(one_hot(x, depth))
    ref = one_hot_ref(x, depth)
    assert out.shape == (B, T, depth), out.shape
    assert out.dtype == jnp.float32, out.dtype
    assert bool(jnp.all(out == ref)), "mismatch vs reference (f32, depth=256)"

    # 2) bf16 fast path (lossless for one-hot values; half the HBM traffic).
    out_bf16 = jax.block_until_ready(one_hot_fast(x, depth))
    assert out_bf16.dtype == jnp.bfloat16
    assert bool(jnp.all(out_bf16.astype(jnp.float32) == ref)), "mismatch (bf16)"

    # 3) Multi-tile T grid with a partial last T tile.
    T3 = 200
    x3 = jax.random.randint(jax.random.PRNGKey(1), (B, T3), 0, 3 * depth,
                            dtype=jnp.int32)
    out3 = jax.block_until_ready(one_hot(x3, depth, tile_t=64))
    assert bool(jnp.all(out3 == one_hot_ref(x3, depth))), \
        "mismatch vs reference (tiled T, partial last tile)"

    # 4) In-kernel T chunk loop (n_chunks > 1) via a forced small chunk.
    T4 = 64
    x4 = jax.random.randint(jax.random.PRNGKey(2), (B, T4), 0, 3 * depth,
                            dtype=jnp.int32)
    out4 = jax.block_until_ready(one_hot(x4, depth, tile_t=64, chunk_t=16))
    assert bool(jnp.all(out4 == one_hot_ref(x4, depth))), \
        "mismatch vs reference (chunked compute)"

    # 5) Non-power-of-two depth exercises the % fallback and lane padding.
    depth5 = 200
    x5 = jax.random.randint(jax.random.PRNGKey(3), (B, T), -depth5, 3 * depth5,
                            dtype=jnp.int32)
    out5 = jax.block_until_ready(one_hot(x5, depth5))
    assert bool(jnp.all(out5 == one_hot_ref(x5, depth5))), \
        "mismatch vs reference (depth=200)"

    # 6) Depth-axis grid (large-vocab path) via a forced small tile_d.
    depth6 = 1024
    x6 = jax.random.randint(jax.random.PRNGKey(4), (B, T), -depth6, 3 * depth6,
                            dtype=jnp.int32)
    out6 = jax.block_until_ready(one_hot(x6, depth6, tile_d=256))
    assert bool(jnp.all(out6 == one_hot_ref(x6, depth6))), \
        "mismatch vs reference (depth-tiled)"

    # 7) Megacore guarantee: B == 1 and a single natural tile -> T is split so
    #    the grid has >= 2 parallel steps.
    x7 = jax.random.randint(jax.random.PRNGKey(5), (1, 16), 0, depth,
                            dtype=jnp.int32)
    out7 = jax.block_until_ready(one_hot(x7, depth))
    assert bool(jnp.all(out7 == one_hot_ref(x7, depth))), \
        "mismatch vs reference (megacore split)"

    print("KERNEL_OK")
</pallas_src>

<mosaic_0001>
module attributes {stable_mosaic.version = 11 : i64} {
  func.func @kernel(%arg0: i32, %arg1: i32, %arg2: i32, %arg3: memref<1x16x1xi32, #tpu.memory_space<vmem>>, %arg4: memref<1x16x256xf32, #tpu.memory_space<vmem>>) attributes {dimension_semantics = [#tpu.dimension_semantics<parallel>, #tpu.dimension_semantics<parallel>, #tpu.dimension_semantics<parallel>], iteration_bounds = array<i64: 2, 1, 1>, scalar_prefetch = 0 : i64, scratch_operands = 0 : i64, tpu.core_type = #tpu.core_type<tc>, window_params = [{transform_indices = @transform_0, window_bounds = array<i64: 1, 16, 1>}, {transform_indices = @transform_1, window_bounds = array<i64: 1, 16, 256>}]} {
    %c0 = arith.constant 0 : index
    %c0_0 = arith.constant 0 : index
    %c0_1 = arith.constant 0 : index
    %0 = vector.load %arg3[%c0, %c0_0, %c0_1] : memref<1x16x1xi32, #tpu.memory_space<vmem>>, vector<1x16x1xi32>
    %1 = vector.shape_cast %0 : vector<1x16x1xi32> to vector<16x1xi32>
    %c255_i32 = arith.constant 255 : i32
    %2 = vector.broadcast %c255_i32 : i32 to vector<16x1xi32>
    %3 = arith.andi %1, %2 : vector<16x1xi32>
    %4 = tpu.iota {dimensions = array<i32: 1>} : vector<16x256xi32>
    %5 = vector.broadcast %3 : vector<16x1xi32> to vector<16x256xi32>
    %6 = arith.cmpi eq, %4, %5 : vector<16x256xi32>
    %7 = arith.extui %6 : vector<16x256xi1> to vector<16x256xi32>
    %8 = arith.sitofp %7 : vector<16x256xi32> to vector<16x256xf32>
    %c0_2 = arith.constant 0 : index
    %c0_3 = arith.constant 0 : index
    %c0_4 = arith.constant 0 : index
    %9 = vector.load %arg4[%c0_2, %c0_3, %c0_4] : memref<1x16x256xf32, #tpu.memory_space<vmem>>, vector<1x16x256xf32>
    %10 = vector.shape_cast %9 : vector<1x16x256xf32> to vector<16x256xf32>
    %11 = vector.shape_cast %8 : vector<16x256xf32> to vector<1x16x256xf32>
    tpu.vector_store %arg4[%c0_2, %c0_3, %c0_4], %11 {strides = array<i32>} : memref<1x16x256xf32, #tpu.memory_space<vmem>>, vector<1x16x256xf32>,
    return
  }
  func.func @transform_0(%arg0: i32, %arg1: i32, %arg2: i32) -> (i32, i32, i32) {
    %c0_i32 = arith.constant 0 : i32
    %c0_i32_0 = arith.constant 0 : i32
    return %arg0, %arg1, %c0_i32 : i32, i32, i32
  }
  func.func @transform_1(%arg0: i32, %arg1: i32, %arg2: i32) -> (i32, i32, i32) {
    %c0_i32 = arith.constant 0 : i32
    return %arg0, %arg1, %arg2 : i32, i32, i32
  }
}

</mosaic_0001>

<bundles_post_ra>
// kernel: tpu_custom_call.1
= control target key start
LH: loop header
LB: loop body
LE: loop exit
PB: predicated region body
PF: predicated region fallthrough
CT: control target
= control target key end

     0   :  { %6 = vsyncpa [#allocation3], 0  ;;  %s703_s0 = inlined_call_operand.hbm [shape: s32[2,16,1], index: 0, kind: input, shape index: {}]   ;;  %s704_s1 = inlined_call_operand.hbm [shape: f32[2,16,256], index: 1, kind: output, shape index: {}]  }
   0x1   :  { %8 = vsyncpa [#allocation3 + $0x1], 0 }
   0x2   :  { %9 = vsyncpa [#allocation4], 0 }
   0x3   :  { %11 = vsyncpa [#allocation4 + $0x1], 0  ;;  %s527_s6 = smov 0   ;;  %s529_s7 = smov 0  }
   0x4   :  { %s531_s8 = smov 0   ;;  %s533_s9 = smov 0  }
   0x5   :  { %s535_s10 = smov 0   ;;  %s537_s11 = smov 0  }
   0x6 LB: > { %s305_s12 = sadd.s32 4294967295, %s507_s11   ;;  %s306_s13 = sadd.s32 4294967294, %s507_s11   ;;  %s507_s11 = sphi %s537_s11, %s17_s11   ;;  %s503_s10 = sphi %s535_s10, %s719_s10   ;;  %s499_s9 = sphi %s533_s9, %s718_s9   ;;  %s495_s8 = sphi %s531_s8, %s717_s8   ;;  %s491_s7 = sphi %s529_s7, %s716_s7   ;;  %s487_s6 = sphi %s527_s6, %s715_s6  }
   0x7   : > { %s36_s14 = sadd.s32 1, %s503_s10  ;;  %s45_s15 = sadd.s32 1, %s495_s8 }
   0x8   : > { %p38_p0 = scmp.ge.s32.totalorder %s36_s14, 2  ;;  %p52_p1 = scmp.ne.s32.totalorder %s495_s8, %s491_s7 }
   0x9   : > { %p53_p2 = scmp.eq.s32.totalorder %s507_s11, 0  ;;  %p58_p3 = scmp.ne.s32.totalorder %s491_s7, %s487_s6 }
   0xa   : > { %s721_s14 = smov (%p38_p0, %s36_s14), 0  ;;  %p59_p5 = scmp.eq.s32.totalorder %s305_s12, 0 }
   0xb   : > { %p568_p4 = por %p53_p2, %p52_p1  ;;  %s40_s17 = ssub.s32 %s503_s10, %s721_s14 }
   0xc   : > { %p86_p6 = scmp.eq.s32.totalorder %s305_s12, 1  ;;  %p43_p7 = scmp.eq.s32.totalorder %s40_s17, 0 }
   0xd   : > { %p574_p8 = por %p59_p5, %p58_p3  ;;  %p92_p10 = scmp.eq.s32.totalorder %s306_s13, 1 }
   0xe   : > { %p578_p9 = por %p86_p6, %p52_p1  ;;  %p338_p13 = scmp.lt.s32.totalorder %s507_s11, 2 }
   0xf   : > { %s583_s20 = scalar_select %p43_p7, %s495_s8, %s45_s15  }
  0x10   : > { %s708_s19 = scalar_select %p578_p9, 1, 0 }
  0x11   : > { %p585_p11 = por %p92_p10, %p58_p3  ;;  %s112_s22 = sand.u32 1, %s495_s8  }
  0x12   : > { %s309_s23 = sshll.u32 %s112_s22, 4  ;;  %s324_s24 = sshll.u32 %s503_s10, 8 }
  0x13   : > { %s709_s21 = scalar_select %p585_p11, 1, 0 }
  0x14   : > { %s596_s27 = scalar_lea.hbm %s703_s0, %s324_s24  ;;  %s116_s28 = scalar_lea.vmem [#allocation2], %s309_s23 }
  0x15   : > { %s125_s29 = sshll.u32 %s116_s28, 4  ;;  %p602_p0 = pnand %p338_p13, %p568_p4  ;;  %s598_s29 = int_to_ptr.vmem [resolvable:$true] %s125_s29 }
  0x16   : > { %s607_s2 = scalar_lea.sflag [#allocation3], %s112_s22  ;;  %s395_s3 = scalar_lea.hbm %s596_s27, 256 }
  0x17   : > { %p396_p2 = scmp.ne.s32.totalorder %s596_s27, %s395_s3  ;;  %p397_p3 = pneg %p602_p0 }
  0x18   : > { %s400_s12 = scalar_lea.hbm %s703_s0, 512  ;;  %p401_p4 = scmp.lt.u32.totalorder %s596_s27, %s703_s0 }
  0x19   : > { %p398_p5 = pnand %p397_p3, %p396_p2  ;;  %p402_p7 = scmp.lt.u32.totalorder %s400_s12, %s395_s3 }
  0x1a   : > { %p404_p13 = scmp.lt.u32.totalorder %s395_s3, %s596_s27 }
  0x1b   : > { %p399_p6 = pneg %p398_p5  ;;  %p403_p10 = por %p402_p7, %p401_p4 }
  0x1d   : > { %p405_p12 = por %p404_p13, %p403_p10 }
  0x1f   : > { %p406_p1 = pnand %p405_p12, %p399_p6 }
  0x21   : > { %409 = shalt.err (!%p406_p1)
}
  0x22   : > { %s410_s16 = scalar_lea.vmem %s598_s29, 256  ;;  %s509_s17 = smov [#allocation2]  }
  0x23   : > { %p411_p2 = scmp.ne.s32.totalorder %s598_s29, %s410_s16  ;;  %s415_s22 = sshll.u32 %s509_s17, 4  ;;  %s416_s22 = int_to_ptr.vmem [resolvable:$false] %s415_s22 }
  0x24   : > { %s417_s23 = scalar_lea.vmem %s416_s22, 512  ;;  %p418_p9 = scmp.lt.s32.totalorder %s598_s29, %s416_s22 }
  0x25   : > { %p413_p5 = pnand %p411_p2, %p397_p3  ;;  %p419_p4 = scmp.lt.s32.totalorder %s417_s23, %s410_s16 }
  0x27   : > { %p414_p11 = pneg %p413_p5  ;;  %p420_p7 = por %p419_p4, %p418_p9 }
  0x29   : > { %p421_p10 = pnand %p420_p7, %p414_p11 }
  0x2b   : > { %424 = shalt.err (!%p421_p10)
}
  0x2c   : > { %s510_s24 = smov 128   ;;  %s511_s25 = smov 8  }
  0x2d   : > { %333 = dma.hbm_to_vmem [thread:$0]  (!%p602_p0), %s596_s27, 256, %s598_s29, %s607_s2, %s510_s24, %s510_s24, %s511_s25  }
  0x2e   : > { %p133_p12 = scmp.lt.s32.totalorder %s507_s11, 3  ;;  %p711_p1 = scmp.ge.s32.totalorder %s507_s11, 1 }
  0x30   : > { %p134_p3 = pnand %p711_p1, %p133_p12 }
  0x31   : > { %s639_s26 = sand.u32 (!%p134_p3), 1, %s491_s7  }
  0x32   : > { %137 = sbr.rel (%p134_p3) target bundleno = 210 (0xd2), region = 24  ;;  %s313_s28 = sshll.u32 (!%p134_p3), %s639_s26, 4 }
  0x33   : > { %s140_s3 = scalar_lea.sflag (!%p134_p3), [#allocation3], %s639_s26  ;;  %s143_s4 = scalar_lea.vmem (!%p134_p3), [#allocation2], %s313_s28 }
  0x39   : > { %478 = dma.done.wait (%p574_p8), %s140_s3, 256  }
  0x3a   : > { %480 = vsyncadd (%p574_p8), %s140_s3, 4294967040  ;;  %v512_v0 = vmov 0   ;;  %v165_v1 = vld [vmem:[%s143_s4] sm:$0xff]  ;;  %v166_v2 = vld [vmem:[%s143_s4 + $0x8] sm:$0xff]  ;;  %v169_v5 = vlaneseq  ;;  %s314_s27 = sshll.u32 %s639_s26, 5  ;;  %s325_s18 = sshll.u32 %s499_s9, 9 }
  0x3b   : > { %394 = vset.pattern.permute.xlu0 %v512_v0  ;;  %v167_v3 = vand.u32 255, %v165_v1  ;;  %v168_v4 = vand.u32 255, %v166_v2  ;;  %s161_s29 = scalar_lea.vmem [#allocation5], %s314_s27  ;;  %v513_v9 = vmov 0.0   ;;  %s654_s12 = scalar_lea.hbm %s704_s1, %s325_s18 }
  0x3c   : > { %v170_v6 = vand.u32 127, %v169_v5  ;;  %s213_s30 = sshll.u32 %s161_s29, 4  ;;  %s195_s9 = scalar_lea.sflag [#allocation4], %s639_s26  ;;  %s649_s30 = int_to_ptr.vmem [resolvable:$true] %s213_s30 }
  0x3d   : > { %173 = vperm.xlu0 %394, %v167_v3   ;;  %s425_s13 = scalar_lea.vmem %s649_s30, 512  ;;  %p712_p9 = scmp.ne.s32.totalorder %s708_s19, 0 }
  0x3e   : > { %v171_v7 = vadd.s32 128, %v170_v6  ;;  %p426_p8 = scmp.ne.s32.totalorder %s649_s30, %s425_s13  ;;  %s514_s15 = smov [#allocation5]  }
  0x3f   : > { %s429_s16 = sshll.u32 %s514_s15, 4  ;;  %s430_s16 = int_to_ptr.vmem [resolvable:$false] %s429_s16 }
  0x40   : > { %p427_p11 = pnand %p426_p8, %p712_p9  ;;  %s431_s17 = scalar_lea.vmem %s430_s16, 1024 }
  0x41   : > { %176 = vperm.xlu0 %394, %v168_v4   ;;  %p432_p6 = scmp.lt.s32.totalorder %s649_s30, %s430_s16  ;;  %p433_p13 = scmp.lt.s32.totalorder %s431_s17, %s425_s13 }
  0x42   : > { %p428_p0 = pneg %p427_p11 }
  0x43   : > { %p434_p2 = por %p433_p13, %p432_p6 }
  0x45   : > { %p435_p5 = pnand %p434_p2, %p428_p0 }
  0xbc   : > { %v174_v8 = vpop.permute.xlu0 %173 }
  0xbd   : > { %vm178_vm0 = vcmp.eq.s32.totalorder %v170_v6, %v174_v8  ;;  %vm179_vm1 = vcmp.eq.s32.totalorder %v171_v7, %v174_v8 }
  0xbe   : > { %v315_v10 = vsel %vm178_vm0, 1.0, %v513_v9  ;;  %v316_v11 = vsel %vm179_vm1, 1.0, %v513_v9 }
  0xbf   : > { %190 = vst [vmem:[%s161_s29] sm:$0xff] %v315_v10  ;;  %191 = vst [vmem:[%s161_s29 + $0x8] sm:$0xff] %v316_v11 }
  0xc0   : > { %v177_v12 = vpop.permute.xlu0 %176 }
  0xc1   : > { %vm180_vm2 = vcmp.eq.s32.totalorder %v170_v6, %v177_v12  ;;  %vm181_vm3 = vcmp.eq.s32.totalorder %v171_v7, %v177_v12 }
  0xc2   : > { %v317_v13 = vsel %vm180_vm2, 1.0, %v513_v9  ;;  %v318_v14 = vsel %vm181_vm3, 1.0, %v513_v9 }
  0xc3   : > { %192 = vst [vmem:[%s161_s29 + $0x10] sm:$0xff] %v317_v13  ;;  %193 = vst [vmem:[%s161_s29 + $0x18] sm:$0xff] %v318_v14 }
  0xc4   : > { %438 = shalt.err (!%p435_p5)
}
  0xc5   : > { %s439_s22 = scalar_lea.hbm %s654_s12, 512  ;;  %s443_s25 = scalar_lea.hbm %s704_s1, 1024 }
  0xc6   : > { %p440_p4 = scmp.ne.s32.totalorder %s654_s12, %s439_s22  ;;  %p444_p12 = scmp.lt.u32.totalorder %s654_s12, %s704_s1 }
  0xc7   : > { %p445_p1 = scmp.lt.u32.totalorder %s443_s25, %s439_s22  ;;  %p447_p8 = scmp.lt.u32.totalorder %s439_s22, %s654_s12 }
  0xc8   : > { %p441_p7 = pnand %p440_p4, %p712_p9 }
  0xc9   : > { %p446_p3 = por %p445_p1, %p444_p12 }
  0xca   : > { %p442_p10 = pneg %p441_p7 }
  0xcb   : > { %p448_p11 = por %p447_p8, %p446_p3 }
  0xcd   : > { %p449_p0 = pnand %p448_p11, %p442_p10 }
  0xcf   : > { %452 = shalt.err (!%p449_p0)
}
  0xd0   : > { %s515_s4 = smov 256   ;;  %s516_s27 = smov 16  }
  0xd1   : > { %328 = dma.vmem_to_hbm [thread:$0]  (%p712_p9), %s649_s30, 512, %s654_s12, %s195_s9, %s515_s4, %s515_s4, %s516_s27  }
  0xd2 PF: > { %s228_s29 = sand.u32 1, %s487_s6   ;;  %p713_p6 = scmp.ne.s32.totalorder %s709_s21, 0 }
  0xd3   : > { %p714_p13 = scmp.ge.s32.totalorder %s507_s11, 2  ;;  %s229_s18 = scalar_lea.sflag [#allocation4], %s228_s29 }
  0xd5   : > { %p335_p2 = pnand %p714_p13, %p713_p6 }
  0xd7   : > { %482 = dma.done.wait (!%p335_p2), %s229_s18, 512  }
  0xd8   : > { %484 = vsyncadd (!%p335_p2), %s229_s18, 4294966784  ;;  %s17_s11 = sadd.s32 1, %s507_s11   ;;  %s715_s6 = smov %s491_s7 }
  0xd9   : > { %p14_p5 = scmp.ge.s32.totalorder %s17_s11, 4   ;;  %s716_s7 = smov %s495_s8 }
  0xda   : > { %s717_s8 = smov %s583_s20  ;;  %s718_s9 = smov %s503_s10 }
  0xdb   : > { %s719_s10 = smov %s721_s14  ;;  %16 = sbr.rel (!%p14_p5) target bundleno = 6 (0x6), region = 69 }
  0xe2   :  { %234 = vsyncpa [#allocation3], 1 }
  0xe3   :  { %236 = vsyncpa [#allocation3 + $0x1], 1 }
  0xe4   :  { %237 = vsyncpa [#allocation4], 1 }
  0xe5   :  { %239 = vsyncpa [#allocation4 + $0x1], 1 }

</bundles_post_ra>
